<compile_context>
chip_gen: v6e
topology: v6e:2x2x1
jax: 0.10.0
libtpu: 0.0.40
codegen_flags: <defaults>
</compile_context>

<pallas_src>
import functools

import jax
import jax.numpy as jnp
from jax.experimental import pallas as pl
from jax.experimental.pallas import tpu as pltpu


def _round_up(x, m):
    return (x + m - 1) // m * m


# -----------------------------------------------------------------------------
# Kernel
# -----------------------------------------------------------------------------
def _rollout_kernel(gx_ref, h0_ref, c0_ref, whh_ref, whead_ref, bhead_ref,
                    out_ref, h_scr, c_scr, *, H, A, GS, HEADW, OUT_W):
    t = pl.program_id(0)

    # Initialize the recurrent state carried in VMEM scratch on the first step.
    @pl.when(t == 0)
    def _init():
        h_scr[...] = h0_ref[...]
        c_scr[...] = c0_ref[...]

    h = h_scr[...]
    c = c_scr[...]

    # Recurrent half of the gate pre-activations; the input half (x @ W_ih + b)
    # was precomputed as one big matmul in the wrapper.  gx_ref block: (1,1,4GS)
    gates = (jnp.dot(h, whh_ref[...], preferred_element_type=jnp.float32)
             + gx_ref[0])

    # PyTorch nn.LSTM gate order: input | forget | cell(g) | output.
    # Each gate occupies a 128-lane-aligned slot of stride GS (>= H).
    i_g = jax.nn.sigmoid(gates[:, 0 * GS:0 * GS + H])
    f_g = jax.nn.sigmoid(gates[:, 1 * GS:1 * GS + H])
    g_g = jnp.tanh(gates[:, 2 * GS:2 * GS + H])
    o_g = jax.nn.sigmoid(gates[:, 3 * GS:3 * GS + H])

    c_new = f_g * c + i_g * g_g
    h_new = o_g * jnp.tanh(c_new)

    h_scr[...] = h_new
    c_scr[...] = c_new

    # Fused actor+critic head: cols [0:A] actor logits, col A critic, rest 0.
    head = (jnp.dot(h_new, whead_ref[...], preferred_element_type=jnp.float32)
            + bhead_ref[...])                                  # [1, HEADW]

    lane = jax.lax.broadcasted_iota(jnp.int32, (1, HEADW), 1)
    amask = lane < A
    m = jnp.max(jnp.where(amask, head, -jnp.inf), axis=-1, keepdims=True)
    e = jnp.where(amask, jnp.exp(head - m), 0.0)
    inv = pl.reciprocal(jnp.sum(e, axis=-1, keepdims=True), approx=True)
    head_out = jnp.where(amask, e * inv, head)   # [probs | value | zeros]

    # Single lane-dense output slab per step: [probs|value|0..| h_t | c_t ]
    out_ref[0, :, 0:HEADW] = head_out
    out_ref[0, :, HEADW:HEADW + H] = h_new
    out_ref[0, :, HEADW + H:HEADW + 2 * H] = c_new
    tail = OUT_W - (HEADW + 2 * H)
    if tail > 0:  # static (trace-time) padding of unused lanes
        out_ref[0, :, HEADW + 2 * H:] = jnp.zeros((1, tail), jnp.float32)


# -----------------------------------------------------------------------------
# Parameter repacking (PyTorch layout -> kernel layout)
# -----------------------------------------------------------------------------
def prepare_params(w_ih, w_hh, b_ih, b_hh, w_a, b_a, w_c, b_c):
    """w_ih:[4H,obs] w_hh:[4H,H] b_*:[4H] w_a:[A,H] b_a:[A] w_c:[1,H] b_c:[1]"""
    four_h, obs = w_ih.shape
    H = four_h // 4
    A = w_a.shape[0]
    GS = _round_up(H, 128)          # lane-aligned per-gate stride
    HEADW = _round_up(A + 1, 128)   # fused actor|critic head width

    wih_pad = jnp.zeros((obs, 4 * GS), jnp.float32)
    whh_pad = jnp.zeros((H, 4 * GS), jnp.float32)
    b_pad = jnp.zeros((1, 4 * GS), jnp.float32)
    b_sum = b_ih + b_hh
    for k in range(4):  # gate order i|f|g|o, each in a lane-aligned slot
        wih_pad = wih_pad.at[:, k * GS:k * GS + H].set(w_ih[k * H:(k + 1) * H, :].T)
        whh_pad = whh_pad.at[:, k * GS:k * GS + H].set(w_hh[k * H:(k + 1) * H, :].T)
        b_pad = b_pad.at[:, k * GS:k * GS + H].set(b_sum[k * H:(k + 1) * H])

    whead = jnp.zeros((H, HEADW), jnp.float32)
    whead = whead.at[:, :A].set(w_a.T)
    whead = whead.at[:, A:A + 1].set(w_c.T)
    bhead = jnp.zeros((1, HEADW), jnp.float32)
    bhead = bhead.at[:, :A].set(b_a)
    bhead = bhead.at[:, A].set(b_c[0])

    return dict(wih_pad=wih_pad, whh_pad=whh_pad, b_pad=b_pad,
                whead=whead, bhead=bhead,
                H=H, A=A, GS=GS, HEADW=HEADW, obs=obs)


# -----------------------------------------------------------------------------
# Wrappers
# -----------------------------------------------------------------------------
def actor_critic_lstm_rollout(xs, h0, c0, params):
    """Run T sequential ActorCriticLSTM.forward() steps in ONE pallas_call.

    xs: [T, obs] (row t == flattened observation of forward-call t)
    h0, c0: [1, H]
    Returns (actor_probs [T, A], critic [T, 1], h_T [1, H], c_T [1, H]).
    """
    H, A, GS, HEADW = params["H"], params["A"], params["GS"], params["HEADW"]
    T = xs.shape[0]
    OUT_W = _round_up(HEADW + 2 * H, 128)

    # Hoist the input projection out of the serial recurrence: one big matmul.
    gx = xs.astype(jnp.float32) @ params["wih_pad"] + params["b_pad"]  # [T,4GS]
    gx3 = gx.reshape(T, 1, 4 * GS)
    h0 = h0.astype(jnp.float32)
    c0 = c0.astype(jnp.float32)

    kernel = functools.partial(_rollout_kernel, H=H, A=A, GS=GS,
                               HEADW=HEADW, OUT_W=OUT_W)

    grid_spec = pltpu.PrefetchScalarGridSpec(
        num_scalar_prefetch=0,
        grid=(T,),
        in_specs=[
            pl.BlockSpec((1, 1, 4 * GS), lambda t: (t, 0, 0)),   # per-step gates_x
            pl.BlockSpec((1, H), lambda t: (0, 0)),              # h0 (resident)
            pl.BlockSpec((1, H), lambda t: (0, 0)),              # c0 (resident)
            pl.BlockSpec((H, 4 * GS), lambda t: (0, 0)),         # W_hh (resident)
            pl.BlockSpec((H, HEADW), lambda t: (0, 0)),          # fused head W
            pl.BlockSpec((1, HEADW), lambda t: (0, 0)),          # fused head b
        ],
        out_specs=pl.BlockSpec((1, 1, OUT_W), lambda t: (t, 0, 0)),
        scratch_shapes=[pltpu.VMEM((1, H), jnp.float32),         # h carry
                        pltpu.VMEM((1, H), jnp.float32)],        # c carry
    )

    out = pl.pallas_call(
        kernel,
        out_shape=jax.ShapeDtypeStruct((T, 1, OUT_W), jnp.float32),
        grid_spec=grid_spec,
        compiler_params=pltpu.CompilerParams(
            dimension_semantics=("arbitrary",)),  # serial recurrence over time
    )(gx3, h0, c0, params["whh_pad"], params["whead"], params["bhead"])

    out2 = out.reshape(T, OUT_W)
    actor = out2[:, :A]
    critic = out2[:, A:A + 1]
    h_T = out2[T - 1:T, HEADW:HEADW + H]
    c_T = out2[T - 1:T, HEADW + H:HEADW + 2 * H]
    return actor, critic, h_T, c_T


def actor_critic_lstm_forward(x, h, c, params):
    """Exactly one module.forward() call (x.view(1,1,-1): single step, batch 1)."""
    return actor_critic_lstm_rollout(x.reshape(1, -1), h, c, params)


# -----------------------------------------------------------------------------
# Test harness
# -----------------------------------------------------------------------------
def init_torch_params(key, obs_space, cell_size, num_outputs):
    ks = jax.random.split(key, 8)
    bound = 1.0 / jnp.sqrt(cell_size)

    def u(k, shape):
        return jax.random.uniform(k, shape, jnp.float32, -bound, bound)

    return dict(
        w_ih=u(ks[0], (4 * cell_size, obs_space)),
        w_hh=u(ks[1], (4 * cell_size, cell_size)),
        b_ih=u(ks[2], (4 * cell_size,)),
        b_hh=u(ks[3], (4 * cell_size,)),
        w_a=u(ks[4], (num_outputs, cell_size)),
        b_a=u(ks[5], (num_outputs,)),
        w_c=u(ks[6], (1, cell_size)),
        b_c=u(ks[7], (1,)),
    )


def reference_rollout(xs, h0, c0, tp):
    """Pure-JAX loop of the PyTorch forward (one call per row of xs)."""
    H = h0.shape[-1]
    wih_t, whh_t = tp["w_ih"].T, tp["w_hh"].T
    b = (tp["b_ih"] + tp["b_hh"]).reshape(1, -1)
    wa_t, wc_t = tp["w_a"].T, tp["w_c"].T
    h, c = h0, c0
    actors, critics = [], []
    for t in range(xs.shape[0]):
        x2 = xs[t:t + 1].astype(jnp.float32)
        gates = x2 @ wih_t + h @ whh_t + b
        i_g = jax.nn.sigmoid(gates[:, 0 * H:1 * H])
        f_g = jax.nn.sigmoid(gates[:, 1 * H:2 * H])
        g_g = jnp.tanh(gates[:, 2 * H:3 * H])
        o_g = jax.nn.sigmoid(gates[:, 3 * H:4 * H])
        c = f_g * c + i_g * g_g
        h = o_g * jnp.tanh(c)
        actors.append(jax.nn.softmax(h @ wa_t + tp["b_a"].reshape(1, -1), axis=-1))
        critics.append(h @ wc_t + tp["b_c"].reshape(1, 1))
    return jnp.concatenate(actors, 0), jnp.concatenate(critics, 0), h, c


if __name__ == "__main__":
    obs_space = 32
    cell_size = 64
    num_outputs = 8
    T = 8  # number of sequential forward() calls fused into one kernel launch

    key = jax.random.PRNGKey(0)
    k_param, k_x, k_h, k_c = jax.random.split(key, 4)

    torch_params = init_torch_params(k_param, obs_space, cell_size, num_outputs)
    params = prepare_params(**torch_params)

    xs = jax.random.normal(k_x, (T, obs_space), jnp.float32)
    h0 = jax.random.normal(k_h, (1, cell_size), jnp.float32) * 0.1
    c0 = jax.random.normal(k_c, (1, cell_size), jnp.float32) * 0.1

    # Multi-step rollout (T forward() calls in one pallas_call).
    actor, critic, h_T, c_T = actor_critic_lstm_rollout(xs, h0, c0, params)
    jax.block_until_ready((actor, critic, h_T, c_T))

    ref_actor, ref_critic, ref_h, ref_c = reference_rollout(xs, h0, c0, torch_params)
    assert jnp.allclose(actor, ref_actor, atol=2e-3, rtol=2e-3), "actor mismatch"
    assert jnp.allclose(critic, ref_critic, atol=1e-4, rtol=1e-4), "critic mismatch"
    assert jnp.allclose(h_T, ref_h, atol=1e-4, rtol=1e-4), "hidden state mismatch"
    assert jnp.allclose(c_T, ref_c, atol=1e-4, rtol=1e-4), "cell state mismatch"
    assert jnp.all(jnp.abs(jnp.sum(actor, axis=-1) - 1.0) < 5e-3), "softmax not normalized"

    # Single-step call (exact semantics of ActorCriticLSTM.forward).
    a1, v1, h1, c1 = actor_critic_lstm_forward(xs[0], h0, c0, params)
    jax.block_until_ready((a1, v1, h1, c1))
    assert jnp.allclose(a1, ref_actor[0:1], atol=2e-3, rtol=2e-3), "single-step actor mismatch"
    assert jnp.allclose(v1, ref_critic[0:1], atol=1e-4, rtol=1e-4), "single-step critic mismatch"

    print("KERNEL_OK")
</pallas_src>

<mosaic_0001>
module attributes {stable_mosaic.version = 11 : i64} {
  func.func @_rollout_kernel(%arg0: i32, %arg1: memref<1x1x512xf32, #tpu.memory_space<vmem>>, %arg2: memref<1x64xf32, #tpu.memory_space<vmem>>, %arg3: memref<1x64xf32, #tpu.memory_space<vmem>>, %arg4: memref<64x512xf32, #tpu.memory_space<vmem>>, %arg5: memref<64x128xf32, #tpu.memory_space<vmem>>, %arg6: memref<1x128xf32, #tpu.memory_space<vmem>>, %arg7: memref<1x1x256xf32, #tpu.memory_space<vmem>>, %arg8: memref<1x64xf32, #tpu.memory_space<vmem>>, %arg9: memref<1x64xf32, #tpu.memory_space<vmem>>) attributes {dimension_semantics = [#tpu.dimension_semantics<arbitrary>], iteration_bounds = array<i64: 8>, scalar_prefetch = 0 : i64, scratch_operands = 2 : i64, tpu.core_type = #tpu.core_type<tc>, window_params = [{transform_indices = @transform_0, window_bounds = array<i64: 1, 1, 512>}, {pipeline_mode = #tpu.pipeline_mode<synchronous>, transform_indices = @transform_1, window_bounds = array<i64: 1, 64>}, {pipeline_mode = #tpu.pipeline_mode<synchronous>, transform_indices = @transform_2, window_bounds = array<i64: 1, 64>}, {pipeline_mode = #tpu.pipeline_mode<synchronous>, transform_indices = @transform_3, window_bounds = array<i64: 64, 512>}, {pipeline_mode = #tpu.pipeline_mode<synchronous>, transform_indices = @transform_4, window_bounds = array<i64: 64, 128>}, {pipeline_mode = #tpu.pipeline_mode<synchronous>, transform_indices = @transform_5, window_bounds = array<i64: 1, 128>}, {transform_indices = @transform_6, window_bounds = array<i64: 1, 1, 256>}]} {
    %c0_i32 = arith.constant 0 : i32
    %0 = arith.cmpi eq, %arg0, %c0_i32 : i32
    %1 = arith.extui %0 : i1 to i32
    %c0_i32_0 = arith.constant 0 : i32
    %2 = arith.cmpi ne, %1, %c0_i32_0 : i32
    scf.if %2 {
      %c0_32 = arith.constant 0 : index
      %c0_33 = arith.constant 0 : index
      %68 = vector.load %arg2[%c0_32, %c0_33] : memref<1x64xf32, #tpu.memory_space<vmem>>, vector<1x64xf32>
      %c0_34 = arith.constant 0 : index
      %c0_35 = arith.constant 0 : index
      %69 = vector.load %arg8[%c0_34, %c0_35] : memref<1x64xf32, #tpu.memory_space<vmem>>, vector<1x64xf32>
      tpu.vector_store %arg8[%c0_34, %c0_35], %68 {strides = array<i32>} : memref<1x64xf32, #tpu.memory_space<vmem>>, vector<1x64xf32>,
      %c0_36 = arith.constant 0 : index
      %c0_37 = arith.constant 0 : index
      %70 = vector.load %arg3[%c0_36, %c0_37] : memref<1x64xf32, #tpu.memory_space<vmem>>, vector<1x64xf32>
      %c0_38 = arith.constant 0 : index
      %c0_39 = arith.constant 0 : index
      %71 = vector.load %arg9[%c0_38, %c0_39] : memref<1x64xf32, #tpu.memory_space<vmem>>, vector<1x64xf32>
      tpu.vector_store %arg9[%c0_38, %c0_39], %70 {strides = array<i32>} : memref<1x64xf32, #tpu.memory_space<vmem>>, vector<1x64xf32>,
    } else {
    }
    %c0 = arith.constant 0 : index
    %c0_1 = arith.constant 0 : index
    %3 = vector.load %arg8[%c0, %c0_1] : memref<1x64xf32, #tpu.memory_space<vmem>>, vector<1x64xf32>
    %c0_2 = arith.constant 0 : index
    %c0_3 = arith.constant 0 : index
    %4 = vector.load %arg9[%c0_2, %c0_3] : memref<1x64xf32, #tpu.memory_space<vmem>>, vector<1x64xf32>
    %c0_4 = arith.constant 0 : index
    %c0_5 = arith.constant 0 : index
    %5 = vector.load %arg4[%c0_4, %c0_5] : memref<64x512xf32, #tpu.memory_space<vmem>>, vector<64x512xf32>
    %cst = arith.constant dense<0.000000e+00> : vector<1x512xf32>
    %6 = tpu.matmul %3, %5, %cst {dimension_numbers = #tpu.dot_dimension_numbers<[1], [0], [0], [1], [0, 0, 1, 1], [], []>} : vector<1x64xf32>, vector<64x512xf32>, vector<1x512xf32> -> vector<1x512xf32>
    %c0_6 = arith.constant 0 : index
    %c0_7 = arith.constant 0 : index
    %c0_8 = arith.constant 0 : index
    %7 = vector.load %arg1[%c0_6, %c0_7, %c0_8] : memref<1x1x512xf32, #tpu.memory_space<vmem>>, vector<1x1x512xf32>
    %8 = vector.shape_cast %7 : vector<1x1x512xf32> to vector<1x512xf32>
    %9 = arith.addf %6, %8 : vector<1x512xf32>
    %10 = vector.extract_strided_slice %9 {offsets = [0, 0], sizes = [1, 64], strides = [1, 1]} : vector<1x512xf32> to vector<1x64xf32>
    %11 = arith.negf %10 : vector<1x64xf32>
    %12 = math.exp %11 : vector<1x64xf32>
    %cst_9 = arith.constant 1.000000e+00 : f32
    %13 = vector.broadcast %cst_9 : f32 to vector<1x64xf32>
    %14 = arith.addf %13, %12 : vector<1x64xf32>
    %15 = arith.divf %13, %14 : vector<1x64xf32>
    %16 = vector.extract_strided_slice %9 {offsets = [0, 128], sizes = [1, 64], strides = [1, 1]} : vector<1x512xf32> to vector<1x64xf32>
    %17 = arith.negf %16 : vector<1x64xf32>
    %18 = math.exp %17 : vector<1x64xf32>
    %cst_10 = arith.constant 1.000000e+00 : f32
    %19 = vector.broadcast %cst_10 : f32 to vector<1x64xf32>
    %20 = arith.addf %19, %18 : vector<1x64xf32>
    %21 = arith.divf %19, %20 : vector<1x64xf32>
    %22 = vector.extract_strided_slice %9 {offsets = [0, 256], sizes = [1, 64], strides = [1, 1]} : vector<1x512xf32> to vector<1x64xf32>
    %23 = math.tanh %22 : vector<1x64xf32>
    %24 = vector.extract_strided_slice %9 {offsets = [0, 384], sizes = [1, 64], strides = [1, 1]} : vector<1x512xf32> to vector<1x64xf32>
    %25 = arith.negf %24 : vector<1x64xf32>
    %26 = math.exp %25 : vector<1x64xf32>
    %cst_11 = arith.constant 1.000000e+00 : f32
    %27 = vector.broadcast %cst_11 : f32 to vector<1x64xf32>
    %28 = arith.addf %27, %26 : vector<1x64xf32>
    %29 = arith.divf %27, %28 : vector<1x64xf32>
    %30 = arith.mulf %21, %4 : vector<1x64xf32>
    %31 = arith.mulf %15, %23 : vector<1x64xf32>
    %32 = arith.addf %30, %31 : vector<1x64xf32>
    %33 = math.tanh %32 : vector<1x64xf32>
    %34 = arith.mulf %29, %33 : vector<1x64xf32>
    %c0_12 = arith.constant 0 : index
    %c0_13 = arith.constant 0 : index
    %35 = vector.load %arg8[%c0_12, %c0_13] : memref<1x64xf32, #tpu.memory_space<vmem>>, vector<1x64xf32>
    tpu.vector_store %arg8[%c0_12, %c0_13], %34 {strides = array<i32>} : memref<1x64xf32, #tpu.memory_space<vmem>>, vector<1x64xf32>,
    %c0_14 = arith.constant 0 : index
    %c0_15 = arith.constant 0 : index
    %36 = vector.load %arg9[%c0_14, %c0_15] : memref<1x64xf32, #tpu.memory_space<vmem>>, vector<1x64xf32>
    tpu.vector_store %arg9[%c0_14, %c0_15], %32 {strides = array<i32>} : memref<1x64xf32, #tpu.memory_space<vmem>>, vector<1x64xf32>,
    %c0_16 = arith.constant 0 : index
    %c0_17 = arith.constant 0 : index
    %37 = vector.load %arg5[%c0_16, %c0_17] : memref<64x128xf32, #tpu.memory_space<vmem>>, vector<64x128xf32>
    %cst_18 = arith.constant dense<0.000000e+00> : vector<1x128xf32>
    %38 = tpu.matmul %34, %37, %cst_18 {dimension_numbers = #tpu.dot_dimension_numbers<[1], [0], [0], [1], [0, 0, 1, 1], [], []>} : vector<1x64xf32>, vector<64x128xf32>, vector<1x128xf32> -> vector<1x128xf32>
    %c0_19 = arith.constant 0 : index
    %c0_20 = arith.constant 0 : index
    %39 = vector.load %arg6[%c0_19, %c0_20] : memref<1x128xf32, #tpu.memory_space<vmem>>, vector<1x128xf32>
    %40 = arith.addf %38, %39 : vector<1x128xf32>
    %41 = tpu.iota {dimensions = array<i32: 1>} : vector<1x128xi32>
    %c8_i32 = arith.constant 8 : i32
    %42 = vector.broadcast %c8_i32 : i32 to vector<1x128xi32>
    %43 = arith.cmpi slt, %41, %42 : vector<1x128xi32>
    %cst_21 = arith.constant 0xFF800000 : f32
    %44 = vector.broadcast %cst_21 : f32 to vector<1x128xf32>
    %45 = arith.select %43, %40, %44 : vector<1x128xi1>, vector<1x128xf32>
    %cst_22 = arith.constant dense<0xFF800000> : vector<1xf32>
    %46 = vector.multi_reduction <maximumf>, %45, %cst_22 [1] : vector<1x128xf32> to vector<1xf32>
    %47 = vector.shape_cast %46 : vector<1xf32> to vector<1x1xf32>
    %48 = vector.broadcast %47 : vector<1x1xf32> to vector<1x128xf32>
    %49 = arith.subf %40, %48 : vector<1x128xf32>
    %50 = math.exp %49 : vector<1x128xf32>
    %cst_23 = arith.constant 0.000000e+00 : f32
    %51 = vector.broadcast %cst_23 : f32 to vector<1x128xf32>
    %52 = arith.select %43, %50, %51 : vector<1x128xi1>, vector<1x128xf32>
    %cst_24 = arith.constant dense<0.000000e+00> : vector<1xf32>
    %53 = vector.multi_reduction <add>, %52, %cst_24 [1] : vector<1x128xf32> to vector<1xf32>
    %54 = vector.shape_cast %53 : vector<1xf32> to vector<1x1xf32>
    %55 = tpu.reciprocal %54 {approx = true} : vector<1x1xf32> -> vector<1x1xf32>
    %56 = vector.broadcast %55 : vector<1x1xf32> to vector<1x128xf32>
    %57 = arith.mulf %52, %56 : vector<1x128xf32>
    %58 = arith.select %43, %57, %40 : vector<1x128xi1>, vector<1x128xf32>
    %c0_25 = arith.constant 0 : index
    %c0_26 = arith.constant 0 : index
    %c0_27 = arith.constant 0 : index
    %59 = vector.load %arg7[%c0_25, %c0_26, %c0_27] : memref<1x1x256xf32, #tpu.memory_space<vmem>>, vector<1x1x128xf32>
    %60 = vector.shape_cast %59 : vector<1x1x128xf32> to vector<1x128xf32>
    %61 = vector.shape_cast %58 : vector<1x128xf32> to vector<1x1x128xf32>
    tpu.vector_store %arg7[%c0_25, %c0_26, %c0_27], %61 {strides = array<i32>} : memref<1x1x256xf32, #tpu.memory_space<vmem>>, vector<1x1x128xf32>,
    %c0_28 = arith.constant 0 : index
    %c0_29 = arith.constant 0 : index
    %c128 = arith.constant 128 : index
    %62 = vector.load %arg7[%c0_28, %c0_29, %c128] : memref<1x1x256xf32, #tpu.memory_space<vmem>>, vector<1x1x64xf32>
    %63 = vector.shape_cast %62 : vector<1x1x64xf32> to vector<1x64xf32>
    %64 = vector.shape_cast %34 : vector<1x64xf32> to vector<1x1x64xf32>
    tpu.vector_store %arg7[%c0_28, %c0_29, %c128], %64 {strides = array<i32>} : memref<1x1x256xf32, #tpu.memory_space<vmem>>, vector<1x1x64xf32>,
    %c0_30 = arith.constant 0 : index
    %c0_31 = arith.constant 0 : index
    %c192 = arith.constant 192 : index
    %65 = vector.load %arg7[%c0_30, %c0_31, %c192] : memref<1x1x256xf32, #tpu.memory_space<vmem>>, vector<1x1x64xf32>
    %66 = vector.shape_cast %65 : vector<1x1x64xf32> to vector<1x64xf32>
    %67 = vector.shape_cast %32 : vector<1x64xf32> to vector<1x1x64xf32>
    tpu.vector_store %arg7[%c0_30, %c0_31, %c192], %67 {strides = array<i32>} : memref<1x1x256xf32, #tpu.memory_space<vmem>>, vector<1x1x64xf32>,
    return
  }
  func.func @transform_0(%arg0: i32) -> (i32, i32, i32) {
    %c0_i32 = arith.constant 0 : i32
    %c0_i32_0 = arith.constant 0 : i32
    %c0_i32_1 = arith.constant 0 : i32
    return %arg0, %c0_i32, %c0_i32_0 : i32, i32, i32
  }
  func.func @transform_1(%arg0: i32) -> (i32, i32) {
    %c0_i32 = arith.constant 0 : i32
    %c0_i32_0 = arith.constant 0 : i32
    %c0_i32_1 = arith.constant 0 : i32
    return %c0_i32, %c0_i32_0 : i32, i32
  }
  func.func @transform_2(%arg0: i32) -> (i32, i32) {
    %c0_i32 = arith.constant 0 : i32
    %c0_i32_0 = arith.constant 0 : i32
    %c0_i32_1 = arith.constant 0 : i32
    return %c0_i32, %c0_i32_0 : i32, i32
  }
  func.func @transform_3(%arg0: i32) -> (i32, i32) {
    %c0_i32 = arith.constant 0 : i32
    %c0_i32_0 = arith.constant 0 : i32
    %c0_i32_1 = arith.constant 0 : i32
    return %c0_i32, %c0_i32_0 : i32, i32
  }
  func.func @transform_4(%arg0: i32) -> (i32, i32) {
    %c0_i32 = arith.constant 0 : i32
    %c0_i32_0 = arith.constant 0 : i32
    %c0_i32_1 = arith.constant 0 : i32
    return %c0_i32, %c0_i32_0 : i32, i32
  }
  func.func @transform_5(%arg0: i32) -> (i32, i32) {
    %c0_i32 = arith.constant 0 : i32
    %c0_i32_0 = arith.constant 0 : i32
    %c0_i32_1 = arith.constant 0 : i32
    return %c0_i32, %c0_i32_0 : i32, i32
  }
  func.func @transform_6(%arg0: i32) -> (i32, i32, i32) {
    %c0_i32 = arith.constant 0 : i32
    %c0_i32_0 = arith.constant 0 : i32
    %c0_i32_1 = arith.constant 0 : i32
    return %arg0, %c0_i32, %c0_i32_0 : i32, i32, i32
  }
}

</mosaic_0001>

<bundles_post_ra>
// kernel: tpu_custom_call.1
= control target key start
LH: loop header
LB: loop body
LE: loop exit
PB: predicated region body
PF: predicated region fallthrough
CT: control target
= control target key end

     0   :  { %s1336_s0 = inlined_call_operand.hbm [shape: f32[8,1,512], index: 0, kind: input, shape index: {}]   ;;  %s1337_s1 = inlined_call_operand.vmem [shape: f32[1,64], index: 1, kind: input, shape index: {}]   ;;  %s1338_s2 = inlined_call_operand.vmem [shape: f32[1,64], index: 2, kind: input, shape index: {}]   ;;  %s1339_s3 = inlined_call_operand.hbm [shape: f32[64,512], index: 3, kind: input, shape index: {}]   ;;  %s1340_s4 = inlined_call_operand.hbm [shape: f32[64,128], index: 4, kind: input, shape index: {}]   ;;  %s1341_s5 = inlined_call_operand.vmem [shape: f32[1,128], index: 5, kind: input, shape index: {}]   ;;  %s1342_s6 = inlined_call_operand.hbm [shape: f32[8,1,256], index: 6, kind: output, shape index: {}]  }
   0x1   :  { %1347 = sst [smem:[#allocation14_spill]] %s1339_s3 }
   0x2   :  { %11 = vsyncpa [#allocation5], 0 }
   0x3   :  { %13 = vsyncpa [#allocation5 + $0x1], 0 }
   0x4   :  { %14 = vsyncpa [#allocation8], 0 }
   0x5   :  { %15 = vsyncpa [#allocation6], 0 }
   0x6   :  { %17 = vsyncpa [#allocation6 + $0x1], 0  ;;  %s1115_s21 = smov 0   ;;  %s1117_s22 = smov 0  }
   0x7   :  { %s1119_s23 = smov 0   ;;  %s1121_s24 = smov 0  }
   0x8 LB: > { %s1136_s25 = sadd.s32 4294967295, %s1066_s24   ;;  %s768_s26 = sadd.s32 4294967294, %s1066_s24   ;;  %s1066_s24 = sphi %s1121_s24, %s1368_s24   ;;  %s1062_s23 = sphi %s1119_s23, %s1367_s23   ;;  %s1058_s22 = sphi %s1117_s22, %s1366_s22   ;;  %s1054_s21 = sphi %s1115_s21, %s1365_s21  }
   0x9   : > { %p43_p0 = scmp.ne.s32.totalorder %s1058_s22, %s1054_s21  ;;  %p1343_p1 = scmp.eq.s32.totalorder %s1136_s25, 0 }
   0xa   : > { %p178_p3 = scmp.eq.s32.totalorder %s768_s26, 7  ;;  %p769_p5 = scmp.ge.s32.totalorder %s1066_s24, 1 }
   0xb   : > { %p1145_p4 = por %p1343_p1, %p43_p0  ;;  %p185_p7 = scmp.lt.s32.totalorder %s1066_s24, 9 }
   0xc   : > { %p1150_p6 = por %p178_p3, %p43_p0  ;;  %s1068_s30 = smov [#allocation7]  }
   0xd   : > { %s1348_s27 = scalar_select %p1145_p4, 1, 0 }
   0xe   : > { %s1349_s28 = scalar_select %p1150_p6, 1, 0 }
   0xf   : > { %p1156_p9 = pnand %p769_p5, %p185_p7  ;;  %s203_s7 = sshll.u32 %s1068_s30, 4  ;;  %s204_s7 = int_to_ptr.vmem [resolvable:$true] %s203_s7 }
  0x10   : > { %s1069_s9 = smov [#allocation9]   ;;  %s929_s11 = scalar_lea.vmem %s204_s7, 4096 }
  0x11   : > { %s1350_s29 = scalar_select %p1156_p9, 1, 0 }
  0x12   : > { %p835_p10 = pneg %p1156_p9  ;;  %s216_s10 = sshll.u32 %s1069_s9, 4  ;;  %s217_s10 = int_to_ptr.vmem [resolvable:$true] %s216_s10 }
  0x13   : > { %p930_p13 = scmp.ne.s32.totalorder %s204_s7, %s929_s11  ;;  %p937_p5 = scmp.lt.s32.totalorder %s204_s7, %s204_s7 }
  0x14   : > { %p1164_p11 = pnand %p835_p10, %p1343_p1  ;;  %p938_p7 = scmp.lt.s32.totalorder %s929_s11, %s929_s11 }
  0x16   : > { %p920_p12 = pneg %p1164_p11  ;;  %p939_p8 = por %p938_p7, %p937_p5 }
  0x18   : > { %p932_p0 = pnand %p930_p13, %p920_p12 }
  0x1a   : > { %p933_p3 = pneg %p932_p0 }
  0x1c   : > { %p940_p10 = pnand %p939_p8, %p933_p3 }
  0x1e   : > { %943 = shalt.err (!%p940_p10)
}
  0x1f   : > { %s1070_s12 = smov 512   ;;  %s1071_s13 = smov 32  }
  0x20   : > { %s1352_s3 = sld [smem:[#allocation14_spill]]  ;;  %s955_s16 = scalar_lea.vmem %s217_s10, 1024 }
  0x21   : > { %p956_p1 = scmp.ne.s32.totalorder %s217_s10, %s955_s16  ;;  %p963_p2 = scmp.lt.s32.totalorder %s217_s10, %s217_s10 }
  0x22   : > { %p964_p6 = scmp.lt.s32.totalorder %s955_s16, %s955_s16 }
  0x23   : > { %p958_p13 = pnand %p956_p1, %p920_p12 }
  0x24   : > { %p965_p5 = por %p964_p6, %p963_p2 }
  0x25   : > { %p959_p0 = pneg %p958_p13 }
  0x26   : > { %838 = dma.hbm_to_vmem [thread:$0]  (!%p1164_p11), %s1352_s3, 4096, %s204_s7, [#allocation8], %s1070_s12, %s1070_s12, %s1071_s13  }
  0x27   : > { %p966_p8 = pnand %p965_p5, %p959_p0 }
  0x29   : > { %969 = shalt.err (!%p966_p8)
}
  0x2a   : > { %s1072_s17 = smov 128   ;;  %s1073_s18 = smov 8  }
  0x2b   : > { %841 = dma.hbm_to_vmem [thread:$0]  (!%p1164_p11), %s1340_s4, 1024, %s217_s10, [#allocation8], %s1072_s17, %s1072_s17, %s1073_s18  }
  0x2c   : > { %s1187_s26 = sadd.s32 1, %s1066_s24   ;;  %s30_s7 = sadd.s32 1, %s1062_s23 }
  0x2d   : > { %s27_s30 = ssub.s32 %s1066_s24, %s1187_s26  ;;  %p37_p2 = scmp.ne.s32.totalorder %s1062_s23, %s1058_s22 }
  0x2e   : > { %p28_p1 = scmp.eq.s32.totalorder %s27_s30, 0  ;;  %p38_p6 = scmp.eq.s32.totalorder %s1066_s24, 0 }
  0x2f   : > { %p1353_p3 = scmp.eq.s32.totalorder %s1136_s25, 7  ;;  %p852_p10 = scmp.lt.s32.totalorder %s1066_s24, 8 }
  0x30   : > { %s1196_s9 = scalar_select %p28_p1, %s1062_s23, %s30_s7  }
  0x31   : > { %p39_p12 = por %p38_p6, %p37_p2  ;;  %p1200_p7 = por %p1353_p3, %p37_p2 }
  0x32   : > { %s233_s8 = sand.u32 1, %s1062_s23   ;;  %s793_s10 = sshll.u32 %s1066_s24, 6 }
  0x33   : > { %s1354_s11 = scalar_select %p1200_p7, 1, 0 }
  0x34   : > { %s773_s12 = sshll.u32 %s233_s8, 2  ;;  %s1210_s15 = scalar_lea.hbm %s1336_s0, %s793_s10 }
  0x35   : > { %s237_s16 = scalar_lea.vmem [#allocation4], %s773_s12  ;;  %p1212_p11 = pnand %p852_p10, %p39_p12 }
  0x36   : > { %s245_s17 = sshll.u32 %s237_s16, 4  ;;  %s234_s19 = scalar_lea.sflag [#allocation5], %s233_s8  ;;  %s246_s17 = int_to_ptr.vmem [resolvable:$true] %s245_s17 }
  0x37   : > { %s970_s20 = scalar_lea.hbm %s1210_s15, 64  ;;  %p972_p0 = pneg %p1212_p11 }
  0x38   : > { %p971_p13 = scmp.ne.s32.totalorder %s1210_s15, %s970_s20  ;;  %s975_s10 = scalar_lea.hbm %s1336_s0, 512 }
  0x39   : > { %p976_p1 = scmp.lt.s32.totalorder %s1210_s15, %s1336_s0  ;;  %p977_p2 = scmp.lt.s32.totalorder %s975_s10, %s970_s20 }
  0x3a   : > { %p973_p5 = pnand %p972_p0, %p971_p13 }
  0x3b   : > { %p978_p6 = por %p977_p2, %p976_p1 }
  0x3c   : > { %p974_p8 = pneg %p973_p5 }
  0x3e   : > { %p979_p12 = pnand %p978_p6, %p974_p8 }
  0x40   : > { %982 = shalt.err (!%p979_p12)
}
  0x41   : > { %s983_s14 = scalar_lea.vmem %s246_s17, 64  ;;  %s1074_s8 = smov [#allocation4]  }
  0x42   : > { %p984_p3 = scmp.ne.s32.totalorder %s246_s17, %s983_s14  ;;  %s988_s16 = sshll.u32 %s1074_s8, 4  ;;  %s989_s16 = int_to_ptr.vmem [resolvable:$false] %s988_s16 }
  0x43   : > { %s990_s3 = scalar_lea.vmem %s989_s16, 128  ;;  %p991_p13 = scmp.lt.s32.totalorder %s246_s17, %s989_s16 }
  0x44   : > { %p986_p10 = pnand %p984_p3, %p972_p0  ;;  %p992_p5 = scmp.lt.s32.totalorder %s990_s3, %s983_s14 }
  0x46   : > { %p987_p7 = pneg %p986_p10  ;;  %p993_p4 = por %p992_p5, %p991_p13 }
  0x48   : > { %p994_p9 = pnand %p993_p4, %p987_p7 }
  0x4a   : > { %997 = shalt.err (!%p994_p9)
}
  0x4b   : > { %845 = dma.hbm_to_vmem [thread:$0]  (!%p1212_p11), %s1210_s15, 64, %s246_s17, %s234_s19  }
  0x4c   : > { %p1356_p8 = scmp.ne.s32.totalorder %s1350_s29, 0 }
  0x4d   : > { %s1233_s20 = sand.u32 (!%p1356_p8), 1, %s1058_s22   ;;  %p1357_p0 = scmp.ne.s32.totalorder (!%p1356_p8), %s1348_s27, 0 }
  0x4e   : > { %254 = sbr.rel (%p1356_p8) target bundleno = 886 (0x376), region = 44  ;;  %s777_s30 = sshll.u32 (!%p1356_p8), %s1233_s20, 2 }
  0x4f   : > { %s257_s7 = scalar_lea.sflag (!%p1356_p8), [#allocation5], %s1233_s20  ;;  %s1237_s10 = scalar_lea.vmem (!%p1356_p8), [#allocation4], %s777_s30 }
  0x53   : > { %1041 = dma.done.wait (%p1357_p0), %s257_s7, 64  }
  0x54   : > { %1043 = vsyncadd (%p1357_p0), %s257_s7, 4294967232  ;;  %p1358_p4 = scmp.eq.s32.totalorder %s1136_s25, 0 }
  0x56   : > { %1045 = dma.done.wait (%p1358_p4), [#allocation8], 5120   ;;  %p1359_p9 = pmov %p1358_p4 }
  0x57   : > { %s780_s3 = sshll.u32 %s1233_s20, 1  ;;  %p1360_p7 = scmp.ne.s32.totalorder %s1136_s25, 0 }
  0x58   : > { %1047 = vsyncadd (%p1359_p9), [#allocation8], 4294962176  ;;  %s1248_s29 = scalar_lea.vmem [#allocation10], %s780_s3 }
  0x59   : > { %300 = sbr.rel (%p1360_p7) target bundleno = 97 (0x61), region = 60 }
  0x5e   : > { %v301_v0 = vld [vmem:[%s1337_s1] sm:$0x1]  ;;  %vm302_vm0 = vcmask 516096  }
  0x5f   : > { %v304_v1 = vld [vmem:[%s1338_s2] sm:$0x1]  ;;  %303 = vst.msk [vmem:[#allocation2] sm:$0x1] %vm302_vm0, %v301_v0 }
  0x60   : > { %305 = vst.msk [vmem:[#allocation3] sm:$0x1] %vm302_vm0, %v304_v1 }
  0x61 PF: > { %v337_v2 = vld [vmem:[#allocation7 + $0xe8] sm:$0xff]  ;;  %v336_v3 = vld [vmem:[#allocation7 + $0xe0] sm:$0xff]  ;;  %v1075_v6 = vmov 0.0   ;;  %v339_v12 = vld [vmem:[#allocation7 + $0xf8] sm:$0xff]  ;;  %vm362_vm1 = vcmask 523264   ;;  %vm1076_vm2 = vmmov 0   ;;  %v342_v44 = vlaneseq }
  0x62   : > { %v333_v4 = vld [vmem:[#allocation7 + $0xc8] sm:$0xff]  ;;  %382 = vmatprep.subr.mxu0 %v337_v2  ;;  %v332_v5 = vld [vmem:[#allocation7 + $0xc0] sm:$0xff]  ;;  %430 = vmatprep.mubr.f32.mxu0 %v1075_v6  ;;  %v338_v13 = vld [vmem:[#allocation7 + $0xf0] sm:$0xff]  ;;  %vm532_vm3 = vcmask 516096   ;;  %s1078_s19 = smov 64   ;;  %vm621_vm9 = vcmask 1040384  }
  0x63   : > { %383 = vmatpush1.msra.mxu0 %v336_v3  ;;  %v329_v7 = vld [vmem:[#allocation7 + $0xa8] sm:$0xff]  ;;  %501 = vmatprep.mubr.f32.mxu1 %v1075_v6  ;;  %v328_v8 = vld [vmem:[#allocation7 + $0xa0] sm:$0xff]  ;;  %v335_v14 = vld [vmem:[#allocation7 + $0xd8] sm:$0xff]  ;;  %v343_v45 = vshrl.u32 %v342_v44, 7  ;;  %vm640_vm4 = vcmp.lt.s32.totalorder %v342_v44, 64  ;;  %vm1277_vm5 = vcmp.lt.s32.totalorder %v342_v44, 128 }
  0x64   : > { %384 = vmatprep.subr.mxu0 %v333_v4  ;;  %v325_v9 = vld [vmem:[#allocation7 + $0x88] sm:$0xff]  ;;  %v324_v10 = vld [vmem:[#allocation7 + $0x80] sm:$0xff]  ;;  %453 = vmatprep.subr.mxu1 %v339_v12  ;;  %v334_v15 = vld [vmem:[#allocation7 + $0xd0] sm:$0xff]  ;;  %vm661_vm6 = vcmp.ge.s32.totalorder %v342_v44, 64  ;;  %s794_s14 = sshll.u32 %s1136_s25, 5  ;;  %s679_s8 = sshll.u32 %s1248_s29, 4  ;;  %s680_s8 = int_to_ptr.vmem [resolvable:$true] %s679_s8 }
  0x65   : > { %385 = vmatpush1.msra.mxu0 %v332_v5  ;;  %v321_v11 = vld [vmem:[#allocation7 + $0x68] sm:$0xff]  ;;  %v320_v16 = vld [vmem:[#allocation7 + $0x60] sm:$0xff]  ;;  %454 = vmatpush1.msra.mxu1 %v338_v13  ;;  %v331_v17 = vld [vmem:[#allocation7 + $0xb8] sm:$0xff]  ;;  %v344_v46 = vsub.s32 0, %v343_v45  ;;  %v348_v48 = vsub.s32 1, %v343_v45  ;;  %v356_v56 = vsub.s32 3, %v343_v45  ;;  %s1296_s7 = scalar_lea.hbm %s1342_s6, %s794_s14 }
  0x66   : > { %386 = vmatprep.subr.mxu0 %v329_v7  ;;  %v317_v18 = vld [vmem:[#allocation7 + $0x48] sm:$0xff]  ;;  %455 = vmatprep.subr.mxu1 %v335_v14  ;;  %v330_v19 = vld [vmem:[#allocation7 + $0xb0] sm:$0xff]  ;;  %v316_v20 = vld [vmem:[#allocation7 + $0x40] sm:$0xff]  ;;  %v352_v59 = vsub.s32 2, %v343_v45  ;;  %s998_s3 = scalar_lea.vmem %s680_s8, 32  ;;  %p1363_p1 = scmp.ne.s32.totalorder %s1354_s11, 0 }
  0x67   : > { %387 = vmatpush1.msra.mxu0 %v328_v8  ;;  %456 = vmatpush1.msra.mxu1 %v334_v15  ;;  %v327_v21 = vld [vmem:[#allocation7 + $0x98] sm:$0xff]  ;;  %v313_v22 = vld [vmem:[#allocation7 + $0x28] sm:$0xff]  ;;  %v326_v23 = vld [vmem:[#allocation7 + $0x90] sm:$0xff]  ;;  %p999_p11 = scmp.ne.s32.totalorder %s680_s8, %s998_s3  ;;  %s1079_s25 = smov [#allocation10]  }
  0x68   : > { %388 = vmatprep.subr.mxu0 %v325_v9  ;;  %457 = vmatprep.subr.mxu1 %v331_v17  ;;  %v312_v24 = vld [vmem:[#allocation7 + $0x20] sm:$0xff]  ;;  %v323_v25 = vld [vmem:[#allocation7 + $0x78] sm:$0xff]  ;;  %v309_v26 = vld [vmem:[#allocation7 + $0x8] sm:$0xff]  ;;  %s1002_s15 = sshll.u32 %s1079_s25, 4  ;;  %s1003_s15 = int_to_ptr.vmem [resolvable:$false] %s1002_s15 }
  0x69   : > { %389 = vmatpush1.msra.mxu0 %v324_v10  ;;  %458 = vmatpush1.msra.mxu1 %v330_v19  ;;  %v322_v27 = vld [vmem:[#allocation7 + $0x70] sm:$0xff]  ;;  %v308_v28 = vld [vmem:[#allocation7] sm:$0xff]  ;;  %v319_v29 = vld [vmem:[#allocation7 + $0x58] sm:$0xff]  ;;  %p1000_p2 = pnand %p999_p11, %p1363_p1  ;;  %s1004_s17 = scalar_lea.vmem %s1003_s15, 64 }
  0x6a   : > { %390 = vmatprep.subr.mxu0 %v321_v11  ;;  %459 = vmatprep.subr.mxu1 %v327_v21  ;;  %v306_v30 = vld [vmem:[#allocation2] sm:$0x1]  ;;  %v315_v32 = vld [vmem:[#allocation7 + $0x38] sm:$0xff]  ;;  %v540_v38 = vld [vmem:[#allocation9 + $0x28] sm:$0xff]  ;;  %p1005_p12 = scmp.lt.s32.totalorder %s680_s8, %s1003_s15  ;;  %p1006_p3 = scmp.lt.s32.totalorder %s1004_s17, %s998_s3 }
  0x6b   : > { %391 = vmatpush1.msra.mxu0 %v320_v16  ;;  %460 = vmatpush1.msra.mxu1 %v326_v23  ;;  %v318_v31 = vld [vmem:[#allocation7 + $0x50] sm:$0xff]  ;;  %v311_v34 = vld [vmem:[#allocation7 + $0x18] sm:$0xff]  ;;  %v539_v39 = vld [vmem:[#allocation9 + $0x20] sm:$0xff]  ;;  %p1001_p6 = pneg %p1000_p2 }
  0x6c   : > { %392 = vmatprep.subr.mxu0 %v317_v18  ;;  %461 = vmatprep.subr.mxu1 %v323_v25  ;;  %v314_v33 = vld [vmem:[#allocation7 + $0x30] sm:$0xff]  ;;  %v542_v36 = vld [vmem:[#allocation9 + $0x38] sm:$0xff]  ;;  %v536_v42 = vld [vmem:[#allocation9 + $0x8] sm:$0xff]  ;;  %p1007_p10 = por %p1006_p3, %p1005_p12 }
  0x6d   : > { %393 = vmatpush1.msra.mxu0 %v316_v20  ;;  %462 = vmatpush1.msra.mxu1 %v322_v27  ;;  %v310_v35 = vld [vmem:[#allocation7 + $0x10] sm:$0xff]  ;;  %v538_v40 = vld [vmem:[#allocation9 + $0x18] sm:$0xff]  ;;  %v535_v43 = vld [vmem:[#allocation9] sm:$0xff] }
  0x6e   : > { %394 = vmatprep.subr.mxu0 %v313_v22  ;;  %463 = vmatprep.subr.mxu1 %v319_v29  ;;  %v541_v37 = vld [vmem:[#allocation9 + $0x30] sm:$0xff]  ;;  %v340_v47 = vld [vmem:[%s1237_s10] sm:$0xf]  ;;  %vm662_vm7 = vmand %vm661_vm6, %vm1277_vm5  ;;  %s665_s10 = scalar_lea.sflag [#allocation6], %s1233_s20  ;;  %p1008_p13 = pnand %p1007_p10, %p1001_p6 }
  0x6f   : > { %395 = vmatpush1.msra.mxu0 %v312_v24  ;;  %464 = vmatpush1.msra.mxu1 %v318_v31  ;;  %v537_v41 = vld [vmem:[#allocation9 + $0x10] sm:$0xff]  ;;  %v345_v49 = vrot.slane %v340_v47, %v344_v46  ;;  %v349_v50 = vrot.slane %v340_v47, %v348_v48  ;;  %v357_v60 = vrot.slane %v340_v47, %v356_v56 }
  0x70   : > { %396 = vmatprep.subr.mxu0 %v309_v26  ;;  %465 = vmatprep.subr.mxu1 %v315_v32  ;;  %v353_v62 = vrot.slane %v340_v47, %v352_v59  ;;  %v307_v12 = vld [vmem:[#allocation3] sm:$0x1]  ;;  %v618_v26 = vand.u32 127, %v342_v44  ;;  %v543_v27 = vld [vmem:[%s1341_s5] sm:$0x1] }
  0x71   : > { %397 = vmatpush1.msra.mxu0 %v308_v28  ;;  %466 = vmatpush1.msra.mxu1 %v314_v33 }
  0x72   : > { %782 = vmatmul.mubr.msk.f32.vlgmr.msra.gmra.mxu0 %vm362_vm1, %v306_v30  ;;  %804 = vmatprep.subr.mxu0 %v1075_v6  ;;  %vm619_vm8 = vcmp.lt.s32.totalorder %v618_v26, 8 }
  0x73   : > { %467 = vmatprep.subr.mxu1 %v311_v34  ;;  %805 = vmatpush3.msra.mxu0 %v542_v36 }
  0x74   : > { %468 = vmatpush1.msra.mxu1 %v310_v35  ;;  %806 = vmatprep.subr.mxu0 %v1075_v6 }
  0x75   : > { %783 = vmatmul.mubr.msk.f32.vlgmr.msra.gmra.mxu1 %vm362_vm1, %v306_v30  ;;  %807 = vmatpush3.msra.mxu0 %v541_v37 }
  0x76   : > { %808 = vmatprep.subr.mxu0 %v1075_v6  ;;  %820 = vmatprep.mubr.msk.f32.mxu0 %vm1076_vm2, %v1075_v6 }
  0x77   : > { %809 = vmatpush3.msra.mxu0 %v540_v38 }
  0x78   : > { %810 = vmatprep.subr.mxu0 %v1075_v6 }
  0x79   : > { %811 = vmatpush3.msra.mxu0 %v539_v39 }
  0x7a   : > { %812 = vmatprep.subr.mxu0 %v1075_v6 }
  0x7b   : > { %813 = vmatpush3.msra.mxu0 %v538_v40 }
  0x7c   : > { %814 = vmatprep.subr.mxu0 %v1075_v6 }
  0x7d   : > { %815 = vmatpush3.msra.mxu0 %v537_v41 }
  0x7e   : > { %816 = vmatprep.subr.mxu0 %v1075_v6 }
  0x7f   : > { %817 = vmatpush3.msra.mxu0 %v536_v42 }
  0x80   : > { %818 = vmatprep.subr.mxu0 %v1075_v6  ;;  %v1077_v6 = vmov 1966171168  }
  0x81   : > { %819 = vmatpush3.msra.mxu0 %v535_v43  ;;  %v645_v7 = vunpack.c.l.s4 %v1077_v6 }
  0x83   : > { %v646_v10 = vunpack.c.0.s8 %v645_v7 }
  0x85   : > { %v649_v17 = vsub.s32 %v646_v10, %v343_v45 }
 0x132   : > { %v432_v51 = vpop.f32.mrf.mxu0 }
 0x133   : > { %v433_v52 = vadd.f32 %v432_v51, %v345_v49 }
 0x134   : > { %v434_v53 = vpop.f32.mrf.mxu0 }
 0x135   : > { %v784_v54 = vmul.f32 -1.442695, %v433_v52  ;;  %v435_v55 = vadd.f32 %v434_v53, %v349_v50  ;;  %v503_v58 = vpop.f32.mrf.mxu1 }
 0x136   : > { %v504_v0 = vadd.f32 %v503_v58, %v353_v62 }
 0x137   : > { %898 = vpow2.f32 %v784_v54  ;;  %v785_v57 = vmul.f32 -1.442695, %v435_v55  ;;  %v505_v61 = vpop.f32.mrf.mxu1 }
 0x138   : > { %v506_v63 = vadd.f32 %v505_v61, %v357_v60 }
 0x139   : > { %900 = vpow2.f32 %v785_v57 }
 0x13a   : > { %v786_v1 = vmul.f32 -1.442695, %v506_v63  ;;  %902 = vtanh.f32 %v504_v0 }
 0x13c   : > { %904 = vpow2.f32 %v786_v1 }
 0x144   : > { %v899_v2 = vpop.eup %898 }
 0x145   : > { %v511_v3 = vadd.f32 1.0, %v899_v2 }
 0x146   : > { %v901_v4 = vpop.eup %900 }
 0x147   : > { %906 = vrcp.f32 %v511_v3  ;;  %v517_v5 = vadd.f32 1.0, %v901_v4  ;;  %v903_v8 = vpop.eup %902 }
 0x149   : > { %908 = vrcp.f32 %v517_v5  ;;  %v905_v9 = vpop.eup %904 }
 0x14a   : > { %v524_v14 = vadd.f32 1.0, %v905_v9 }
 0x14c   : > { %910 = vrcp.f32 %v524_v14 }
 0x154   : > { %v907_v11 = vpop.eup %906 }
 0x155   : > { %v528_v16 = vmul.f32 %v907_v11, %v903_v8 }
 0x156   : > { %v909_v13 = vpop.eup %908 }
 0x157   : > { %v527_v15 = vmul.f32 %v909_v13, %v307_v12 }
 0x159   : > { %v529_v18 = vadd.f32 %v528_v16, %v527_v15  ;;  %v911_v21 = vpop.eup %910 }
 0x15b   : > { %v650_v19 = vrot.slane %v529_v18, %v649_v17  ;;  %912 = vtanh.f32 %v529_v18  ;;  %534 = vst.msk [vmem:[#allocation3] sm:$0x1] %vm532_vm3, %v529_v18 }
 0x15d   : > { %v657_v20 = vrot.slane %v650_v19, %v649_v17 }
 0x15f   : > { %658 = vrot.lane.b32.xlu1 %v657_v20, %s1078_s19 }
 0x168   : > { %v913_v22 = vpop.eup %912 }
 0x169   : > { %v531_v23 = vmul.f32 %v913_v22, %v911_v21 }
 0x16b   : > { %533 = vst.msk [vmem:[#allocation2] sm:$0x1] %vm532_vm3, %v531_v23  ;;  %821 = vmatmul.mubr.msk.f32.vlgmr.msra.gmra.mxu0 %vm362_vm1, %v531_v23 }
 0x16c   : > { %642 = vst.msk [vmem:[%s1248_s29 + $0x1] sm:$0x1] %vm640_vm4, %v531_v23 }
 0x1d1   : > { %v659_v25 = vpop.permute.xlu1 %658 }
 0x1d2   : > { %663 = vst.msk [vmem:[%s1248_s29 + $0x1] sm:$0x1] %vm662_vm7, %v659_v25 }
 0x22b   : > { %v613_v28 = vpop.f32.mrf.mxu0 }
 0x22c   : > { %v614_v29 = vadd.f32 %v613_v28, %v543_v27 }
 0x22d   : > { %v822_v30 = vpop.f32.mrf.mxu0 }
 0x22e   : > { %v620_v31 = vsel %vm619_vm8, %v614_v29, -inf }
 0x22f   : > { %v622_v32 = vsel %vm621_vm9, %v620_v31, -inf }
 0x230   : > { %623 = vmax.xlane.f32.xlu0 %v622_v32 }
 0x2b9   : > { %v624_v33 = vpop.xlane.xlu0 %623 }
 0x2ba   : > { %v625_v34 = vsub.f32 %v614_v29, %v624_v33 }
 0x2bc   : > { %v626_v35 = vmul.f32 1.442695, %v625_v34 }
 0x2be   : > { %914 = vpow2.f32 %v626_v35 }
 0x2cb   : > { %v915_v36 = vpop.eup %914 }
 0x2cc   : > { %v628_v37 = vsel %vm619_vm8, %v915_v36, 0.0 }
 0x2cd   : > { %v629_v38 = vsel %vm621_vm9, %v628_v37, 0.0 }
 0x2ce   : > { %630 = vadd.xlane.f32.xlu0 %v629_v38 }
 0x357   : > { %v631_v39 = vpop.xlane.xlu0 %630 }
 0x358   : > { %916 = vrcp.f32 %v631_v39 }
 0x365   : > { %v917_v40 = vpop.eup %916 }
 0x366   : > { %v633_v41 = vmul.f32 %v917_v40, %v628_v37 }
 0x368   : > { %v634_v42 = vsel %vm619_vm8, %v633_v41, %v614_v29 }
 0x369   : > { %639 = vst.msk [vmem:[%s1248_s29] sm:$0x1] %vm1277_vm5, %v634_v42 }
 0x36a   : > { %1011 = shalt.err (!%p1008_p13)
}
 0x36b   : > { %s1012_s29 = scalar_lea.hbm %s1296_s7, 32  ;;  %s1016_s18 = scalar_lea.hbm %s1342_s6, 256 }
 0x36c   : > { %p1013_p5 = scmp.ne.s32.totalorder %s1296_s7, %s1012_s29  ;;  %p1017_p4 = scmp.lt.s32.totalorder %s1296_s7, %s1342_s6 }
 0x36d   : > { %p1018_p9 = scmp.lt.s32.totalorder %s1016_s18, %s1012_s29 }
 0x36e   : > { %p1014_p8 = pnand %p1013_p5, %p1363_p1 }
 0x36f   : > { %p1019_p7 = por %p1018_p9, %p1017_p4 }
 0x370   : > { %p1015_p0 = pneg %p1014_p8 }
 0x372   : > { %p1020_p11 = pnand %p1019_p7, %p1015_p0 }
 0x374   : > { %1023 = shalt.err (!%p1020_p11)
}
 0x375   : > { %833 = dma.vmem_to_hbm [thread:$0]  (%p1363_p1), %s680_s8, 32, %s1296_s7, %s665_s10  }
 0x376 PF: > { %p855_p2 = scmp.ge.s32.totalorder %s1066_s24, 2  ;;  %s691_s12 = sand.u32 1, %s1054_s21  }
 0x377   : > { %p1364_p6 = scmp.ne.s32.totalorder %s1349_s28, 0  ;;  %s692_s14 = scalar_lea.sflag [#allocation6], %s691_s12 }
 0x379   : > { %p847_p12 = pnand %p855_p2, %p1364_p6 }
 0x37b   : > { %p848_p3 = pneg %p847_p12 }
 0x37d   : > { %1049 = dma.done.wait (%p848_p3), %s692_s14, 32  }
 0x37e   : > { %1051 = vsyncadd (%p848_p3), %s692_s14, 4294967264  ;;  %p20_p10 = scmp.ge.s32.totalorder %s1187_s26, 10   ;;  %s1365_s21 = smov %s1058_s22 }
 0x37f   : > { %s1366_s22 = smov %s1062_s23  ;;  %s1367_s23 = smov %s1196_s9 }
 0x380   : > { %s1368_s24 = smov %s1187_s26  ;;  %22 = sbr.rel (!%p20_p10) target bundleno = 8 (0x8), region = 101 }
 0x385   :  { %697 = vsyncpa [#allocation5], 1 }
 0x386   :  { %699 = vsyncpa [#allocation5 + $0x1], 1 }
 0x387   :  { %700 = vsyncpa [#allocation8], 1 }
 0x388   :  { %701 = vsyncpa [#allocation6], 1 }
 0x389   :  { %703 = vsyncpa [#allocation6 + $0x1], 1 }

</bundles_post_ra>
